<compile_context>
chip_gen: v7x
topology: tpu7x:2x2x1
jax: 0.10.0
libtpu: 0.0.40
codegen_flags: <defaults>
</compile_context>

<pallas_src>
from copy import copy

import jax
import jax.numpy as jnp
from jax.experimental import pallas as pl
from jax.experimental.pallas import tpu as pltpu

_LANES = 128
_TARGET_BLOCK_BYTES = 4 << 20      # ~4 MiB per input block per pipeline buffer
_NCORES = 2                        # leading "parallel" axis (v7x megacore); fine on 1-TC chips
_SMALL_N_FALLBACK = 16384          # below this, pallas_call fixed cost dominates
_VMEM_HEADROOM = 4 << 20


def _cdiv(a, b):
    return -(-a // b)


def _round_up(a, b):
    return _cdiv(a, b) * b


def _make_kernel(nblocks, blocks_per_core, block_rows, last_valid_rows):
    """Kernel computing sum|x-y| and sum((x-y)^2) over (block_rows, 128) tiles.

    Only the last data block (if partial) runs the masked branch; duplicate
    clamped blocks (when nblocks doesn't split evenly across cores) are skipped.
    """
    mask_last = last_valid_rows < block_rows  # static

    def _accumulate(acc1_ref, acc2_ref, d):
        # Fold the (block_rows, 128) tile into the (8, 128) accumulators with
        # pure elementwise VPU adds (no cross-lane work in the hot path).
        acc1_ref[...] += jnp.sum(jnp.abs(d).reshape(-1, 8, _LANES), axis=0)
        acc2_ref[...] += jnp.sum((d * d).reshape(-1, 8, _LANES), axis=0)

    def kernel(x_ref, y_ref, out_ref, acc1, acc2):
        p = pl.program_id(0)           # core / parallel axis
        k = pl.program_id(1)           # reduction ("arbitrary") axis

        @pl.when(k == 0)
        def _init():
            acc1[...] = jnp.zeros_like(acc1)
            acc2[...] = jnp.zeros_like(acc2)

        blk = p * blocks_per_core + k
        n_full = nblocks - 1 if mask_last else nblocks

        # Hot path: full, in-range blocks -> no masks, no iota materialization.
        @pl.when(blk < n_full)
        def _hot():
            d = x_ref[...].astype(jnp.float32) - y_ref[...].astype(jnp.float32)
            _accumulate(acc1, acc2, d)

        if mask_last:
            # Last data block only: rows past the end of the (padded) array are
            # unspecified VMEM -> zero them before accumulating.
            @pl.when(blk == nblocks - 1)
            def _tail():
                d = x_ref[...].astype(jnp.float32) - y_ref[...].astype(jnp.float32)
                row = jax.lax.broadcasted_iota(jnp.int32, (block_rows, _LANES), 0)
                d = jnp.where(row < last_valid_rows, d, 0.0)
                _accumulate(acc1, acc2, d)

        # blk >= nblocks (clamped duplicate block): skipped entirely.

        @pl.when(k == pl.num_programs(1) - 1)
        def _finalize():
            s1 = jnp.sum(acc1[...])    # single-vreg cross-lane reduce, once per core
            s2 = jnp.sum(acc2[...])
            r = jax.lax.broadcasted_iota(jnp.int32, (8, _LANES), 0)
            c = jax.lax.broadcasted_iota(jnp.int32, (8, _LANES), 1)
            out = jnp.where((r == 0) & (c == 0), s1, 0.0)
            out = jnp.where((r == 0) & (c == 1), s2, out)
            out_ref[...] = out.reshape(1, 8, _LANES)

    return kernel


def _loss_sums_impl(pred, gt):
    assert pred.shape == gt.shape, (pred.shape, gt.shape)
    n = int(pred.size)

    if n < _SMALL_N_FALLBACK:
        # Tiny tensors: a fused XLA reduction beats the pallas_call fixed cost.
        d = pred.astype(jnp.float32) - gt.astype(jnp.float32)
        return jnp.sum(jnp.abs(d)), jnp.sum(d * d), n

    x = pred.reshape(-1)
    y = gt.reshape(-1)

    # Sublane granularity from the narrowest input dtype (f32:8, bf16:16, i8:32).
    itemsize_min = min(x.dtype.itemsize, y.dtype.itemsize)
    itemsize_max = max(x.dtype.itemsize, y.dtype.itemsize)
    sublane = max(8, 32 // max(1, itemsize_min))

    rows = _cdiv(n, _LANES)
    rows_p = _round_up(rows, sublane)
    if rows_p * _LANES != n:
        # Uncommon ragged case: zero-pad so the 2-D lane view is legal and
        # sublane-aligned.  Padded elements are zero in BOTH inputs, so they
        # contribute exactly 0 to both sums (no in-kernel lane mask needed).
        pad = rows_p * _LANES - n
        x = jnp.pad(x, (0, pad))
        y = jnp.pad(y, (0, pad))
    x = x.reshape(rows_p, _LANES)
    y = y.reshape(rows_p, _LANES)

    # Block sizing by bytes (~4 MiB per input per buffer) so per-step overhead
    # stays small; multiple of the sublane granularity; never exceeds the array.
    block_rows = max(sublane,
                     (_TARGET_BLOCK_BYTES // (_LANES * itemsize_max)) // sublane * sublane)
    block_rows = min(block_rows, rows_p)
    nblocks = _cdiv(rows_p, block_rows)

    ncores = _NCORES if nblocks >= _NCORES else 1
    bpc = _cdiv(nblocks, ncores)

    if ncores * bpc == nblocks:
        in_map = lambda p, k: (p * bpc + k, 0)
    else:
        # Clamp so the DMA never indexes past the last block; the in-kernel
        # pl.when(blk < nblocks) skips the duplicated block's contribution.
        in_map = lambda p, k: (jnp.minimum(p * bpc + k, nblocks - 1), 0)

    last_valid_rows = rows_p - (nblocks - 1) * block_rows

    # Explicit VMEM limit: 2 inputs x 2 pipeline buffers x block bytes + headroom.
    # (Default scoped limit -- 16 MiB on v5e -- would reject the larger blocks;
    # cap well below v7x's 64 MiB physical VMEM.)
    in_block_bytes = block_rows * _LANES * (x.dtype.itemsize + y.dtype.itemsize)
    vmem_limit = int(min(2 * in_block_bytes + _VMEM_HEADROOM, 48 << 20))

    kernel = _make_kernel(nblocks, bpc, block_rows, last_valid_rows)
    sums = pl.pallas_call(
        kernel,
        out_shape=jax.ShapeDtypeStruct((ncores, 8, _LANES), jnp.float32),
        grid_spec=pltpu.PrefetchScalarGridSpec(
            num_scalar_prefetch=0,
            grid=(ncores, bpc),
            in_specs=[
                pl.BlockSpec((block_rows, _LANES), in_map),
                pl.BlockSpec((block_rows, _LANES), in_map),
            ],
            out_specs=pl.BlockSpec((1, 8, _LANES), lambda p, k: (p, 0, 0)),
            scratch_shapes=[
                pltpu.VMEM((8, _LANES), jnp.float32),
                pltpu.VMEM((8, _LANES), jnp.float32),
            ],
        ),
        compiler_params=pltpu.CompilerParams(
            dimension_semantics=("parallel", "arbitrary"),
            vmem_limit_bytes=vmem_limit,
        ),
    )(x, y)

    l1_sum = jnp.sum(sums[:, 0, 0])
    l2_sum = jnp.sum(sums[:, 0, 1])
    return l1_sum, l2_sum, n


# Per-forward-call memo stack (NOT a module-level result cache): entries live
# only for the duration of the outermost MultiLoss.forward call, so no tracers
# or results leak across jit traces, and chained losses over the same
# (pred, gt) pair share a single fused Pallas pass.
# TODO(synk): use threading.local() if losses are evaluated from multiple threads.
_MEMO_STACK = []


def _loss_sums(pred, gt):
    """Both reductions in one HBM pass; memoized within a single forward call."""
    memo = _MEMO_STACK[-1] if _MEMO_STACK else None
    key = (id(pred), id(gt))
    if memo is not None and key in memo:
        return memo[key]
    res = _loss_sums_impl(pred, gt)
    if memo is not None:
        memo[key] = res
    return res


class MultiLoss:
    """JAX port of dust3r MultiLoss: combinable losses tracking individual values.

    loss = MyLoss1() + 0.1 * MyLoss2()
    """

    def __init__(self):
        self._alpha = 1
        self._loss2 = None

    def compute_loss(self, *args, **kwargs):
        raise NotImplementedError()

    def get_name(self):
        raise NotImplementedError()

    def __mul__(self, alpha):
        assert isinstance(alpha, (int, float))
        res = copy(self)
        res._alpha = alpha
        return res

    __rmul__ = __mul__

    def __add__(self, loss2):
        assert isinstance(loss2, MultiLoss)
        res = cur = copy(self)
        while cur._loss2 is not None:
            cur = cur._loss2
        cur._loss2 = loss2
        return res

    def __repr__(self):
        name = self.get_name()
        if self._alpha != 1:
            name = f'{self._alpha:g}*{name}'
        if self._loss2:
            name = f'{name} + {self._loss2}'
        return name

    def __call__(self, *args, **kwargs):
        return self.forward(*args, **kwargs)

    def forward(self, *args, **kwargs):
        is_outermost = not _MEMO_STACK
        if is_outermost:
            _MEMO_STACK.append({})
        try:
            loss = self.compute_loss(*args, **kwargs)
            if isinstance(loss, tuple):
                loss, details = loss
            elif loss.ndim == 0:
                # Keep the device scalar (no forced host sync; also jit-safe).
                details = {self.get_name(): loss}
            else:
                details = {}
            loss = loss * self._alpha
            if self._loss2:
                loss2, details2 = self._loss2(*args, **kwargs)
                loss = loss + loss2
                details |= details2
            return (loss, details)
        finally:
            if is_outermost:
                _MEMO_STACK.pop()


class L1Loss(MultiLoss):
    """Mean absolute error, reduction done in the (shared) Pallas kernel pass."""

    def get_name(self):
        return 'L1Loss'

    def compute_loss(self, pred, gt):
        l1_sum, _, n = _loss_sums(pred, gt)
        return l1_sum / jnp.float32(n)


class MSELoss(MultiLoss):
    """Mean squared error, reduction done in the (shared) Pallas kernel pass."""

    def get_name(self):
        return 'MSELoss'

    def compute_loss(self, pred, gt):
        _, l2_sum, n = _loss_sums(pred, gt)
        return l2_sum / jnp.float32(n)


if __name__ == "__main__":
    key = jax.random.PRNGKey(0)
    k1, k2, k3, k4 = jax.random.split(key, 4)

    # Combined loss exercising the MultiLoss combinator semantics.
    loss_fn = L1Loss() + 0.1 * MSELoss()

    # (1) Pallas kernel path (single block, no mask), PyTorch-style NCHW inputs.
    pred = jax.random.normal(k1, (2, 4, 64, 64), dtype=jnp.float32)
    gt = jax.random.normal(k2, (2, 4, 64, 64), dtype=jnp.float32)
    loss, details = loss_fn(pred, gt)
    loss = jax.block_until_ready(loss)
    ref = jnp.mean(jnp.abs(pred - gt)) + 0.1 * jnp.mean((pred - gt) ** 2)
    assert jnp.allclose(loss, ref, rtol=1e-5, atol=1e-5), (loss, ref)

    # (2) Multi-block path: odd nblocks -> exercises 2-core split, clamped
    #     duplicate-block skip and the masked last-block branch.
    pred_l = jax.random.normal(k1, (2, 17, 256, 256), dtype=jnp.float32)
    gt_l = jax.random.normal(k2, (2, 17, 256, 256), dtype=jnp.float32)
    loss_l, _ = loss_fn(pred_l, gt_l)
    loss_l = jax.block_until_ready(loss_l)
    ref_l = jnp.mean(jnp.abs(pred_l - gt_l)) + 0.1 * jnp.mean((pred_l - gt_l) ** 2)
    assert jnp.allclose(loss_l, ref_l, rtol=1e-5, atol=1e-5), (loss_l, ref_l)

    # (3) Ragged bf16 inputs: exercises zero-padding + in-kernel cast to f32.
    pred_r = jax.random.normal(k3, (3, 5, 37, 41), dtype=jnp.bfloat16)
    gt_r = jax.random.normal(k4, (3, 5, 37, 41), dtype=jnp.bfloat16)
    loss_r, _ = loss_fn(pred_r, gt_r)
    loss_r = jax.block_until_ready(loss_r)
    d_r = pred_r.astype(jnp.float32) - gt_r.astype(jnp.float32)
    ref_r = jnp.mean(jnp.abs(d_r)) + 0.1 * jnp.mean(d_r * d_r)
    assert jnp.allclose(loss_r, ref_r, rtol=1e-4, atol=1e-4), (loss_r, ref_r)

    # (4) Tiny inputs: fused XLA fallback (no Pallas launch), same semantics.
    pred_s = jax.random.normal(k1, (2, 4, 16, 16), dtype=jnp.float32)
    gt_s = jax.random.normal(k2, (2, 4, 16, 16), dtype=jnp.float32)
    loss_s, _ = loss_fn(pred_s, gt_s)
    loss_s = jax.block_until_ready(loss_s)
    ref_s = jnp.mean(jnp.abs(pred_s - gt_s)) + 0.1 * jnp.mean((pred_s - gt_s) ** 2)
    assert jnp.allclose(loss_s, ref_s, rtol=1e-5, atol=1e-5), (loss_s, ref_s)

    print("KERNEL_OK")
</pallas_src>

<mosaic_0001>
module attributes {stable_mosaic.version = 11 : i64} {
  func.func @kernel(%arg0: i32, %arg1: i32, %arg2: memref<256x128xf32, #tpu.memory_space<vmem>>, %arg3: memref<256x128xf32, #tpu.memory_space<vmem>>, %arg4: memref<1x8x128xf32, #tpu.memory_space<vmem>>, %arg5: memref<8x128xf32, #tpu.memory_space<vmem>>, %arg6: memref<8x128xf32, #tpu.memory_space<vmem>>) attributes {dimension_semantics = [#tpu.dimension_semantics<parallel>, #tpu.dimension_semantics<arbitrary>], iteration_bounds = array<i64: 1, 1>, scalar_prefetch = 0 : i64, scratch_operands = 2 : i64, tpu.core_type = #tpu.core_type<tc>, window_params = [{transform_indices = @transform_0, window_bounds = array<i64: 256, 128>}, {transform_indices = @transform_1, window_bounds = array<i64: 256, 128>}, {transform_indices = @transform_2, window_bounds = array<i64: 1, 8, 128>}]} {
    %c0_i32 = arith.constant 0 : i32
    %0 = arith.cmpi eq, %arg1, %c0_i32 : i32
    %1 = arith.extui %0 : i1 to i32
    %c0_i32_0 = arith.constant 0 : i32
    %2 = arith.cmpi ne, %1, %c0_i32_0 : i32
    scf.if %2 {
      %cst = arith.constant 0.000000e+00 : f32
      %11 = vector.broadcast %cst : f32 to vector<8x128xf32>
      %c0 = arith.constant 0 : index
      %c0_5 = arith.constant 0 : index
      %12 = vector.load %arg5[%c0, %c0_5] : memref<8x128xf32, #tpu.memory_space<vmem>>, vector<8x128xf32>
      tpu.vector_store %arg5[%c0, %c0_5], %11 {strides = array<i32>} : memref<8x128xf32, #tpu.memory_space<vmem>>, vector<8x128xf32>,
      %cst_6 = arith.constant 0.000000e+00 : f32
      %13 = vector.broadcast %cst_6 : f32 to vector<8x128xf32>
      %c0_7 = arith.constant 0 : index
      %c0_8 = arith.constant 0 : index
      %14 = vector.load %arg6[%c0_7, %c0_8] : memref<8x128xf32, #tpu.memory_space<vmem>>, vector<8x128xf32>
      tpu.vector_store %arg6[%c0_7, %c0_8], %13 {strides = array<i32>} : memref<8x128xf32, #tpu.memory_space<vmem>>, vector<8x128xf32>,
    } else {
    }
    %c1_i32 = arith.constant 1 : i32
    %3 = arith.muli %arg0, %c1_i32 : i32
    %4 = arith.addi %3, %arg1 : i32
    %c1_i32_1 = arith.constant 1 : i32
    %5 = arith.cmpi slt, %4, %c1_i32_1 : i32
    %6 = arith.extui %5 : i1 to i32
    %c0_i32_2 = arith.constant 0 : i32
    %7 = arith.cmpi ne, %6, %c0_i32_2 : i32
    scf.if %7 {
      %c0 = arith.constant 0 : index
      %c0_5 = arith.constant 0 : index
      %11 = vector.load %arg2[%c0, %c0_5] : memref<256x128xf32, #tpu.memory_space<vmem>>, vector<256x128xf32>
      %c0_6 = arith.constant 0 : index
      %c0_7 = arith.constant 0 : index
      %12 = vector.load %arg3[%c0_6, %c0_7] : memref<256x128xf32, #tpu.memory_space<vmem>>, vector<256x128xf32>
      %13 = arith.subf %11, %12 : vector<256x128xf32>
      %c0_8 = arith.constant 0 : index
      %c0_9 = arith.constant 0 : index
      %14 = vector.load %arg5[%c0_8, %c0_9] : memref<8x128xf32, #tpu.memory_space<vmem>>, vector<8x128xf32>
      %15 = math.absf %13 : vector<256x128xf32>
      %16 = vector.shape_cast %15 : vector<256x128xf32> to vector<32x8x128xf32>
      %cst = arith.constant dense<0.000000e+00> : vector<8x128xf32>
      %17 = vector.multi_reduction <add>, %16, %cst [0] : vector<32x8x128xf32> to vector<8x128xf32>
      %18 = arith.addf %14, %17 : vector<8x128xf32>
      %c0_10 = arith.constant 0 : index
      %c0_11 = arith.constant 0 : index
      %19 = vector.load %arg5[%c0_10, %c0_11] : memref<8x128xf32, #tpu.memory_space<vmem>>, vector<8x128xf32>
      tpu.vector_store %arg5[%c0_10, %c0_11], %18 {strides = array<i32>} : memref<8x128xf32, #tpu.memory_space<vmem>>, vector<8x128xf32>,
      %c0_12 = arith.constant 0 : index
      %c0_13 = arith.constant 0 : index
      %20 = vector.load %arg6[%c0_12, %c0_13] : memref<8x128xf32, #tpu.memory_space<vmem>>, vector<8x128xf32>
      %21 = arith.mulf %13, %13 : vector<256x128xf32>
      %22 = vector.shape_cast %21 : vector<256x128xf32> to vector<32x8x128xf32>
      %cst_14 = arith.constant dense<0.000000e+00> : vector<8x128xf32>
      %23 = vector.multi_reduction <add>, %22, %cst_14 [0] : vector<32x8x128xf32> to vector<8x128xf32>
      %24 = arith.addf %20, %23 : vector<8x128xf32>
      %c0_15 = arith.constant 0 : index
      %c0_16 = arith.constant 0 : index
      %25 = vector.load %arg6[%c0_15, %c0_16] : memref<8x128xf32, #tpu.memory_space<vmem>>, vector<8x128xf32>
      tpu.vector_store %arg6[%c0_15, %c0_16], %24 {strides = array<i32>} : memref<8x128xf32, #tpu.memory_space<vmem>>, vector<8x128xf32>,
    } else {
    }
    %c0_i32_3 = arith.constant 0 : i32
    %8 = arith.cmpi eq, %arg1, %c0_i32_3 : i32
    %9 = arith.extui %8 : i1 to i32
    %c0_i32_4 = arith.constant 0 : i32
    %10 = arith.cmpi ne, %9, %c0_i32_4 : i32
    scf.if %10 {
      %c0 = arith.constant 0 : index
      %c0_5 = arith.constant 0 : index
      %11 = vector.load %arg5[%c0, %c0_5] : memref<8x128xf32, #tpu.memory_space<vmem>>, vector<8x128xf32>
      %12 = vector.shape_cast %11 : vector<8x128xf32> to vector<1x8x128xf32>
      %cst = arith.constant dense<0.000000e+00> : vector<1xf32>
      %13 = vector.multi_reduction <add>, %12, %cst [1, 2] : vector<1x8x128xf32> to vector<1xf32>
      %14 = vector.shape_cast %13 : vector<1xf32> to vector<1x1x1xf32>
      %15 = vector.extract %14[0, 0, 0] : f32 from vector<1x1x1xf32>
      %c0_6 = arith.constant 0 : index
      %c0_7 = arith.constant 0 : index
      %16 = vector.load %arg6[%c0_6, %c0_7] : memref<8x128xf32, #tpu.memory_space<vmem>>, vector<8x128xf32>
      %17 = vector.shape_cast %16 : vector<8x128xf32> to vector<1x8x128xf32>
      %cst_8 = arith.constant dense<0.000000e+00> : vector<1xf32>
      %18 = vector.multi_reduction <add>, %17, %cst_8 [1, 2] : vector<1x8x128xf32> to vector<1xf32>
      %19 = vector.shape_cast %18 : vector<1xf32> to vector<1x1x1xf32>
      %20 = vector.extract %19[0, 0, 0] : f32 from vector<1x1x1xf32>
      %21 = tpu.iota {dimensions = array<i32: 0>} : vector<8x128xi32>
      %22 = tpu.iota {dimensions = array<i32: 1>} : vector<8x128xi32>
      %c0_i32_9 = arith.constant 0 : i32
      %23 = vector.broadcast %c0_i32_9 : i32 to vector<8x128xi32>
      %24 = arith.cmpi eq, %21, %23 : vector<8x128xi32>
      %c0_i32_10 = arith.constant 0 : i32
      %25 = vector.broadcast %c0_i32_10 : i32 to vector<8x128xi32>
      %26 = arith.cmpi eq, %22, %25 : vector<8x128xi32>
      %27 = arith.andi %24, %26 : vector<8x128xi1>
      %cst_11 = arith.constant 0.000000e+00 : f32
      %28 = vector.broadcast %15 : f32 to vector<8x128xf32>
      %29 = vector.broadcast %cst_11 : f32 to vector<8x128xf32>
      %30 = arith.select %27, %28, %29 : vector<8x128xi1>, vector<8x128xf32>
      %c0_i32_12 = arith.constant 0 : i32
      %31 = vector.broadcast %c0_i32_12 : i32 to vector<8x128xi32>
      %32 = arith.cmpi eq, %21, %31 : vector<8x128xi32>
      %c1_i32_13 = arith.constant 1 : i32
      %33 = vector.broadcast %c1_i32_13 : i32 to vector<8x128xi32>
      %34 = arith.cmpi eq, %22, %33 : vector<8x128xi32>
      %35 = arith.andi %32, %34 : vector<8x128xi1>
      %36 = vector.broadcast %20 : f32 to vector<8x128xf32>
      %37 = arith.select %35, %36, %30 : vector<8x128xi1>, vector<8x128xf32>
      %38 = vector.shape_cast %37 : vector<8x128xf32> to vector<1x8x128xf32>
      %c0_14 = arith.constant 0 : index
      %c0_15 = arith.constant 0 : index
      %c0_16 = arith.constant 0 : index
      %39 = vector.load %arg4[%c0_14, %c0_15, %c0_16] : memref<1x8x128xf32, #tpu.memory_space<vmem>>, vector<1x8x128xf32>
      tpu.vector_store %arg4[%c0_14, %c0_15, %c0_16], %38 {strides = array<i32>} : memref<1x8x128xf32, #tpu.memory_space<vmem>>, vector<1x8x128xf32>,
    } else {
    }
    return
  }
  func.func @transform_0(%arg0: i32, %arg1: i32) -> (i32, i32) {
    %c1_i32 = arith.constant 1 : i32
    %0 = arith.muli %arg0, %c1_i32 : i32
    %1 = arith.addi %0, %arg1 : i32
    %c0_i32 = arith.constant 0 : i32
    %c0_i32_0 = arith.constant 0 : i32
    return %1, %c0_i32 : i32, i32
  }
  func.func @transform_1(%arg0: i32, %arg1: i32) -> (i32, i32) {
    %c1_i32 = arith.constant 1 : i32
    %0 = arith.muli %arg0, %c1_i32 : i32
    %1 = arith.addi %0, %arg1 : i32
    %c0_i32 = arith.constant 0 : i32
    %c0_i32_0 = arith.constant 0 : i32
    return %1, %c0_i32 : i32, i32
  }
  func.func @transform_2(%arg0: i32, %arg1: i32) -> (i32, i32, i32) {
    %c0_i32 = arith.constant 0 : i32
    %c0_i32_0 = arith.constant 0 : i32
    %c0_i32_1 = arith.constant 0 : i32
    return %arg0, %c0_i32, %c0_i32_0 : i32, i32, i32
  }
}

</mosaic_0001>

<bundles_post_ra>
// kernel: tpu_custom_call.1
= control target key start
LH: loop header
LB: loop body
LE: loop exit
PB: predicated region body
PF: predicated region fallthrough
CT: control target
= control target key end

     0   :  { %7 = vsyncpa [#allocation5], 0  ;;  %s551_s0 = inlined_call_operand.hbm [shape: f32[256,128], index: 0, kind: input, shape index: {}]   ;;  %s552_s1 = inlined_call_operand.hbm [shape: f32[256,128], index: 1, kind: input, shape index: {}]   ;;  %s553_s2 = inlined_call_operand.hbm [shape: f32[1,8,128], index: 2, kind: output, shape index: {}]  }
   0x1   :  { %8 = vsyncpa [#allocation8], 0 }
   0x2   :  { %9 = vsyncpa [#allocation6], 0  ;;  %s425_s9 = smov [#allocation4]   ;;  %s353_s13 = scalar_lea.hbm %s551_s0, 4096 }
   0x3   :  { %s19_s10 = sshll.u32 %s425_s9, 4  ;;  %p354_p0 = scmp.ne.s32.totalorder %s551_s0, %s353_s13  ;;  %s20_s10 = int_to_ptr.vmem [resolvable:$true] %s19_s10 }
   0x4   :  { %p357_p1 = scmp.lt.u32.totalorder %s353_s13, %s551_s0 }
   0x6   :  { %p359_p2 = pnand %p357_p1, %p354_p0 }
   0x8   :  { %362 = shalt.err (!%p359_p2)
}
   0x9   :  { %s363_s18 = scalar_lea.vmem %s20_s10, 4096  ;;  %p368_p4 = scmp.lt.s32.totalorder %s20_s10, %s20_s10 }
   0xa   :  { %p364_p3 = scmp.ne.s32.totalorder %s20_s10, %s363_s18  ;;  %p369_p5 = scmp.lt.s32.totalorder %s363_s18, %s363_s18 }
   0xc   :  { %p370_p6 = por %p369_p5, %p368_p4 }
   0xe   :  { %p371_p7 = pnand %p370_p6, %p364_p3 }
  0x10   :  { %374 = shalt.err (!%p371_p7)
}
  0x11   :  { %s426_s19 = smov 128   ;;  %s427_s20 = smov 8  }
  0x12   :  { %25 = dma.hbm_to_vmem [thread:$0]  %s551_s0, 4096, %s20_s10, [#allocation5], %s426_s19, %s426_s19, %s427_s20  }
  0x13   :  { %s428_s23 = smov [#allocation7]   ;;  %s375_s27 = scalar_lea.hbm %s552_s1, 4096 }
  0x14   :  { %s35_s24 = sshll.u32 %s428_s23, 4  ;;  %p376_p8 = scmp.ne.s32.totalorder %s552_s1, %s375_s27  ;;  %s36_s24 = int_to_ptr.vmem [resolvable:$true] %s35_s24 }
  0x15   :  { %p379_p9 = scmp.lt.u32.totalorder %s375_s27, %s552_s1 }
  0x17   :  { %p381_p10 = pnand %p379_p9, %p376_p8 }
  0x19   :  { %384 = shalt.err (!%p381_p10)
}
  0x1a   :  { %s385_s4 = scalar_lea.vmem %s36_s24, 4096  ;;  %p390_p12 = scmp.lt.s32.totalorder %s36_s24, %s36_s24 }
  0x1b   :  { %p386_p11 = scmp.ne.s32.totalorder %s36_s24, %s385_s4  ;;  %p391_p13 = scmp.lt.s32.totalorder %s385_s4, %s385_s4 }
  0x1d   :  { %p392_p0 = por %p391_p13, %p390_p12 }
  0x1f   :  { %p393_p1 = pnand %p392_p0, %p386_p11 }
  0x21   :  { %396 = shalt.err (!%p393_p1)
}
  0x22   :  { %41 = dma.hbm_to_vmem [thread:$0]  %s552_s1, 4096, %s36_s24, [#allocation8], %s426_s19, %s426_s19, %s427_s20  }
  0x23   :  { %419 = dma.done.wait [#allocation5], 4096  }
  0x24   :  { %420 = vsyncadd [#allocation5], 4294963200 }
  0x25   :  { %421 = dma.done.wait [#allocation8], 4096  }
  0x26   :  { %422 = vsyncadd [#allocation8], 4294963200  ;;  %v63_v0 = vld [vmem:[#allocation4] sm:$0xff]  ;;  %v64_v1 = vld [vmem:[#allocation4 + $0x8] sm:$0xff]  ;;  %s429_s6 = smov [#allocation9]  }
  0x27   :  { %v95_v2 = vld [vmem:[#allocation7] sm:$0xff]  ;;  %v96_v3 = vld [vmem:[#allocation7 + $0x8] sm:$0xff]  ;;  %v65_v4 = vld [vmem:[#allocation4 + $0x10] sm:$0xff]  ;;  %s334_s7 = sshll.u32 %s429_s6, 4  ;;  %s335_s7 = int_to_ptr.vmem [resolvable:$true] %s334_s7 }
  0x28   :  { %v97_v5 = vld [vmem:[#allocation7 + $0x10] sm:$0xff]  ;;  %v127_v6 = vsub.f32 %v63_v0, %v95_v2  ;;  %v128_v7 = vsub.f32 %v64_v1, %v96_v3  ;;  %v66_v8 = vld [vmem:[#allocation4 + $0x18] sm:$0xff]  ;;  %v67_v11 = vld [vmem:[#allocation4 + $0x20] sm:$0xff]  ;;  %s397_s9 = scalar_lea.vmem %s335_s7, 128  ;;  %p402_p3 = scmp.lt.s32.totalorder %s335_s7, %s335_s7 }
  0x29   :  { %v98_v9 = vld [vmem:[#allocation7 + $0x18] sm:$0xff]  ;;  %v129_v10 = vsub.f32 %v65_v4, %v97_v5  ;;  %v99_v12 = vld [vmem:[#allocation7 + $0x20] sm:$0xff]  ;;  %v68_v16 = vld [vmem:[#allocation4 + $0x28] sm:$0xff]  ;;  %p398_p2 = scmp.ne.s32.totalorder %s335_s7, %s397_s9  ;;  %p403_p4 = scmp.lt.s32.totalorder %s397_s9, %s397_s9 }
  0x2a   :  { %v130_v13 = vsub.f32 %v66_v8, %v98_v9  ;;  %v160_v14 = vand.u32 2147483647, %v127_v6  ;;  %v161_v15 = vand.u32 2147483647, %v128_v7  ;;  %v100_v17 = vld [vmem:[#allocation7 + $0x28] sm:$0xff]  ;;  %v131_v18 = vsub.f32 %v67_v11, %v99_v12  ;;  %v69_v20 = vld [vmem:[#allocation4 + $0x30] sm:$0xff] }
  0x2b   :  { %v162_v19 = vand.u32 2147483647, %v129_v10  ;;  %v101_v21 = vld [vmem:[#allocation7 + $0x30] sm:$0xff]  ;;  %v132_v22 = vsub.f32 %v68_v16, %v100_v17  ;;  %v70_v25 = vld [vmem:[#allocation4 + $0x38] sm:$0xff]  ;;  %v71_v30 = vld [vmem:[#allocation4 + $0x40] sm:$0xff]  ;;  %v226_v52 = vmul.f32 %v127_v6, %v127_v6  ;;  %v227_v53 = vmul.f32 %v128_v7, %v128_v7  ;;  %p404_p5 = por %p403_p4, %p402_p3 }
  0x2c   :  { %v163_v23 = vand.u32 2147483647, %v130_v13  ;;  %v192_v24 = vadd.f32 %v161_v15, %v160_v14  ;;  %v102_v26 = vld [vmem:[#allocation7 + $0x38] sm:$0xff]  ;;  %v133_v27 = vsub.f32 %v69_v20, %v101_v21  ;;  %v164_v28 = vand.u32 2147483647, %v131_v18  ;;  %v103_v31 = vld [vmem:[#allocation7 + $0x40] sm:$0xff] }
  0x2d   :  { %v134_v32 = vsub.f32 %v70_v25, %v102_v26  ;;  %v165_v33 = vand.u32 2147483647, %v132_v22  ;;  %v72_v35 = vld [vmem:[#allocation4 + $0x48] sm:$0xff]  ;;  %v135_v37 = vsub.f32 %v71_v30, %v103_v31  ;;  %v73_v40 = vld [vmem:[#allocation4 + $0x50] sm:$0xff]  ;;  %v74_v45 = vld [vmem:[#allocation4 + $0x58] sm:$0xff]  ;;  %v228_v59 = vmul.f32 %v129_v10, %v129_v10  ;;  %p405_p6 = pnand %p404_p5, %p398_p2 }
  0x2e   :  { %v193_v29 = vadd.f32 %v192_v24, %v162_v19  ;;  %v104_v36 = vld [vmem:[#allocation7 + $0x48] sm:$0xff]  ;;  %v166_v38 = vand.u32 2147483647, %v133_v27  ;;  %v105_v41 = vld [vmem:[#allocation7 + $0x50] sm:$0xff]  ;;  %v106_v46 = vld [vmem:[#allocation7 + $0x58] sm:$0xff]  ;;  %v229_v1 = vmul.f32 %v130_v13, %v130_v13  ;;  %v258_v2 = vadd.f32 %v227_v53, %v226_v52 }
  0x2f   :  { %v469_v42 = vsub.f32 %v72_v35, %v104_v36  ;;  %v167_v43 = vand.u32 2147483647, %v134_v32  ;;  %v471_v47 = vsub.f32 %v73_v40, %v105_v41  ;;  %v168_v48 = vand.u32 2147483647, %v135_v37  ;;  %v75_v50 = vld [vmem:[#allocation4 + $0x60] sm:$0xff]  ;;  %v76_v57 = vld [vmem:[#allocation4 + $0x68] sm:$0xff] }
  0x30   :  { %v194_v34 = vadd.f32 %v193_v29, %v163_v23  ;;  %v107_v51 = vld [vmem:[#allocation7 + $0x60] sm:$0xff]  ;;  %v473_v54 = vsub.f32 %v74_v45, %v106_v46  ;;  %v108_v58 = vld [vmem:[#allocation7 + $0x68] sm:$0xff]  ;;  %v77_v63 = vld [vmem:[#allocation4 + $0x70] sm:$0xff]  ;;  %v230_v8 = vmul.f32 %v131_v18, %v131_v18  ;;  %v259_v9 = vadd.f32 %v258_v2, %v228_v59 }
  0x31   :  { %v169_v55 = vand.u32 2147483647, %v469_v42  ;;  %v476_v60 = vsub.f32 %v75_v50, %v107_v51  ;;  %v170_v61 = vand.u32 2147483647, %v471_v47  ;;  %v109_v0 = vld [vmem:[#allocation7 + $0x70] sm:$0xff]  ;;  %v479_v3 = vsub.f32 %v76_v57, %v108_v58  ;;  %v78_v6 = vld [vmem:[#allocation4 + $0x78] sm:$0xff] }
  0x32   :  { %v195_v39 = vadd.f32 %v194_v34, %v164_v28  ;;  %v171_v4 = vand.u32 2147483647, %v473_v54  ;;  %v110_v7 = vld [vmem:[#allocation7 + $0x78] sm:$0xff]  ;;  %v482_v11 = vsub.f32 %v77_v63, %v109_v0  ;;  %v79_v14 = vld [vmem:[#allocation4 + $0x80] sm:$0xff]  ;;  %v231_v16 = vmul.f32 %v132_v22, %v132_v22  ;;  %v80_v21 = vld [vmem:[#allocation4 + $0x88] sm:$0xff] }
  0x33   :  { %v172_v10 = vand.u32 2147483647, %v476_v60  ;;  %v111_v15 = vld [vmem:[#allocation7 + $0x80] sm:$0xff]  ;;  %v260_v17 = vadd.f32 %v259_v9, %v229_v1  ;;  %v485_v13 = vsub.f32 %v78_v6, %v110_v7  ;;  %v173_v19 = vand.u32 2147483647, %v479_v3  ;;  %v112_v23 = vld [vmem:[#allocation7 + $0x88] sm:$0xff] }
  0x34   :  { %v196_v44 = vadd.f32 %v195_v39, %v165_v33  ;;  %v232_v24 = vmul.f32 %v133_v27, %v133_v27  ;;  %v488_v18 = vsub.f32 %v79_v14, %v111_v15  ;;  %v174_v26 = vand.u32 2147483647, %v482_v11  ;;  %v81_v29 = vld [vmem:[#allocation4 + $0x90] sm:$0xff]  ;;  %v82_v36 = vld [vmem:[#allocation4 + $0x98] sm:$0xff]  ;;  %v115_v45 = vld [vmem:[#allocation7 + $0xa0] sm:$0xff] }
  0x35   :  { %v261_v25 = vadd.f32 %v260_v17, %v230_v8  ;;  %v113_v30 = vld [vmem:[#allocation7 + $0x90] sm:$0xff]  ;;  %v233_v31 = vmul.f32 %v134_v32, %v134_v32  ;;  %v491_v22 = vsub.f32 %v80_v21, %v112_v23  ;;  %v175_v34 = vand.u32 2147483647, %v485_v13  ;;  %v84_v51 = vld [vmem:[#allocation4 + $0xa8] sm:$0xff]  ;;  %v86_v1 = vld [vmem:[#allocation4 + $0xb8] sm:$0xff] }
  0x36   :  { %v197_v49 = vadd.f32 %v196_v44, %v166_v38  ;;  %v114_v38 = vld [vmem:[#allocation7 + $0x98] sm:$0xff]  ;;  %v234_v39 = vmul.f32 %v135_v37, %v135_v37  ;;  %v494_v27 = vsub.f32 %v81_v29, %v113_v30  ;;  %v176_v41 = vand.u32 2147483647, %v488_v18  ;;  %v83_v44 = vld [vmem:[#allocation4 + $0xa0] sm:$0xff]  ;;  %v116_v52 = vld [vmem:[#allocation7 + $0xa8] sm:$0xff] }
  0x37   :  { %v262_v33 = vadd.f32 %v261_v25, %v231_v16  ;;  %v235_v32 = vmul.f32 %v469_v42, %v469_v42  ;;  %v236_v37 = vmul.f32 %v471_v47, %v471_v47  ;;  %v85_v58 = vld [vmem:[#allocation4 + $0xb0] sm:$0xff]  ;;  %v237_v42 = vmul.f32 %v473_v54, %v473_v54  ;;  %v118_v2 = vld [vmem:[#allocation7 + $0xb8] sm:$0xff]  ;;  %v87_v8 = vld [vmem:[#allocation4 + $0xc0] sm:$0xff] }
  0x38   :  { %v198_v56 = vadd.f32 %v197_v49, %v167_v43  ;;  %v177_v49 = vand.u32 2147483647, %v491_v22  ;;  %v117_v59 = vld [vmem:[#allocation7 + $0xb0] sm:$0xff]  ;;  %v238_v47 = vmul.f32 %v476_v60, %v476_v60  ;;  %v119_v9 = vld [vmem:[#allocation7 + $0xc0] sm:$0xff]  ;;  %v239_v54 = vmul.f32 %v479_v3, %v479_v3  ;;  %v88_v16 = vld [vmem:[#allocation4 + $0xc8] sm:$0xff] }
  0x39   :  { %v263_v40 = vadd.f32 %v262_v33, %v232_v24  ;;  %v120_v17 = vld [vmem:[#allocation7 + $0xc8] sm:$0xff]  ;;  %v240_v60 = vmul.f32 %v482_v11, %v482_v11  ;;  %v89_v24 = vld [vmem:[#allocation4 + $0xd0] sm:$0xff]  ;;  %v241_v3 = vmul.f32 %v485_v13, %v485_v13  ;;  %v122_v33 = vld [vmem:[#allocation7 + $0xd8] sm:$0xff] }
  0x3a   :  { %v199_v62 = vadd.f32 %v198_v56, %v168_v48  ;;  %v499_v48 = vsub.f32 %v82_v36, %v114_v38  ;;  %v178_v56 = vand.u32 2147483647, %v494_v27  ;;  %v121_v25 = vld [vmem:[#allocation7 + $0xd0] sm:$0xff] }
  0x3b   :  { %v264_v46 = vadd.f32 %v263_v40, %v233_v31  ;;  %v90_v31 = vld [vmem:[#allocation4 + $0xd8] sm:$0xff]  ;;  %v123_v40 = vld [vmem:[#allocation7 + $0xe0] sm:$0xff] }
  0x3c   :  { %v200_v5 = vadd.f32 %v199_v62, %v169_v55  ;;  %v504_v55 = vsub.f32 %v83_v44, %v115_v45  ;;  %v509_v62 = vsub.f32 %v84_v51, %v116_v52  ;;  %v179_v63 = vand.u32 2147483647, %v499_v48 }
  0x3d   :  { %v265_v53 = vadd.f32 %v264_v46, %v234_v39  ;;  %v91_v39 = vld [vmem:[#allocation4 + $0xe0] sm:$0xff]  ;;  %v154_v13 = vsub.f32 %v90_v31, %v122_v33  ;;  %v124_v46 = vld [vmem:[#allocation7 + $0xe8] sm:$0xff] }
  0x3e   :  { %v201_v12 = vadd.f32 %v200_v5, %v170_v61  ;;  %v514_v5 = vsub.f32 %v85_v58, %v117_v59  ;;  %v180_v6 = vand.u32 2147483647, %v504_v55  ;;  %v181_v14 = vand.u32 2147483647, %v509_v62 }
  0x3f   :  { %v266_v61 = vadd.f32 %v265_v53, %v235_v32  ;;  %v92_v32 = vld [vmem:[#allocation4 + $0xe8] sm:$0xff]  ;;  %v125_v53 = vld [vmem:[#allocation7 + $0xf0] sm:$0xff]  ;;  %v187_v58 = vand.u32 2147483647, %v154_v13 }
  0x40   :  { %v202_v20 = vadd.f32 %v201_v12, %v171_v4  ;;  %v150_v12 = vsub.f32 %v86_v1, %v118_v2  ;;  %v182_v21 = vand.u32 2147483647, %v514_v5 }
  0x41   :  { %v267_v4 = vadd.f32 %v266_v61, %v236_v37  ;;  %v93_v37 = vld [vmem:[#allocation4 + $0xf0] sm:$0xff]  ;;  %v126_v61 = vld [vmem:[#allocation7 + $0xf8] sm:$0xff] }
  0x42   :  { %v203_v28 = vadd.f32 %v202_v20, %v172_v10  ;;  %v151_v20 = vsub.f32 %v87_v8, %v119_v9  ;;  %v183_v29 = vand.u32 2147483647, %v150_v12  ;;  %v248_v8 = vmul.f32 %v514_v5, %v514_v5 }
  0x43   :  { %v268_v10 = vadd.f32 %v267_v4, %v237_v42  ;;  %v94_v42 = vld [vmem:[#allocation4 + $0xf8] sm:$0xff] }
  0x44   :  { %v204_v35 = vadd.f32 %v203_v28, %v173_v19  ;;  %v152_v28 = vsub.f32 %v88_v16, %v120_v17  ;;  %v184_v36 = vand.u32 2147483647, %v151_v20  ;;  %v250_v17 = vmul.f32 %v151_v20, %v151_v20 }
  0x45   :  { %v269_v19 = vadd.f32 %v268_v10, %v238_v47  ;;  %v247_v47 = vmul.f32 %v509_v62, %v509_v62 }
  0x46   :  { %v205_v43 = vadd.f32 %v204_v35, %v174_v26  ;;  %v153_v35 = vsub.f32 %v89_v24, %v121_v25  ;;  %v185_v44 = vand.u32 2147483647, %v152_v28 }
  0x47   :  { %v270_v26 = vadd.f32 %v269_v19, %v239_v54 }
  0x48   :  { %v206_v50 = vadd.f32 %v205_v43, %v175_v34  ;;  %v242_v34 = vmul.f32 %v488_v18, %v488_v18  ;;  %v155_v18 = vsub.f32 %v91_v39, %v123_v40  ;;  %v186_v51 = vand.u32 2147483647, %v153_v35 }
  0x49   :  { %v271_v11 = vadd.f32 %v270_v26, %v240_v60  ;;  %v252_v24 = vmul.f32 %v153_v35, %v153_v35 }
  0x4a   :  { %v207_v57 = vadd.f32 %v206_v50, %v176_v41  ;;  %v243_v41 = vmul.f32 %v491_v22, %v491_v22  ;;  %v156_v22 = vsub.f32 %v92_v32, %v124_v46  ;;  %v188_v1 = vand.u32 2147483647, %v155_v18 }
  0x4b   :  { %v272_v43 = vadd.f32 %v271_v11, %v241_v3  ;;  %v253_v3 = vmul.f32 %v154_v13, %v154_v13 }
  0x4c   :  { %v208_v0 = vadd.f32 %v207_v57, %v177_v49  ;;  %v244_v49 = vmul.f32 %v494_v27, %v494_v27  ;;  %v157_v27 = vsub.f32 %v93_v37, %v125_v53 }
  0x4d   :  { %v273_v50 = vadd.f32 %v272_v43, %v242_v34 }
  0x4e   :  { %v209_v7 = vadd.f32 %v208_v0, %v178_v56  ;;  %v245_v56 = vmul.f32 %v499_v48, %v499_v48  ;;  %v190_v54 = vand.u32 2147483647, %v157_v27  ;;  %v256_v33 = vmul.f32 %v157_v27, %v157_v27 }
  0x4f   :  { %v274_v57 = vadd.f32 %v273_v50, %v243_v41 }
  0x50   :  { %v210_v15 = vadd.f32 %v209_v7, %v179_v63  ;;  %v246_v63 = vmul.f32 %v504_v55, %v504_v55  ;;  %v189_v7 = vand.u32 2147483647, %v156_v22 }
  0x51   :  { %v275_v0 = vadd.f32 %v274_v57, %v244_v49 }
  0x52   :  { %v211_v23 = vadd.f32 %v210_v15, %v180_v6  ;;  %v158_v6 = vsub.f32 %v94_v42, %v126_v61 }
  0x53   :  { %v276_v4 = vadd.f32 %v275_v0, %v245_v56 }
  0x54   :  { %v212_v30 = vadd.f32 %v211_v23, %v181_v14  ;;  %v249_v14 = vmul.f32 %v150_v12, %v150_v12  ;;  %v191_v55 = vand.u32 2147483647, %v158_v6  ;;  %v257_v34 = vmul.f32 %v158_v6, %v158_v6 }
  0x55   :  { %v277_v9 = vadd.f32 %v276_v4, %v246_v63 }
  0x56   :  { %v213_v38 = vadd.f32 %v212_v30, %v182_v21  ;;  %v251_v21 = vmul.f32 %v152_v28, %v152_v28  ;;  %v255_v30 = vmul.f32 %v156_v22, %v156_v22 }
  0x57   :  { %v278_v15 = vadd.f32 %v277_v9, %v247_v47 }
  0x58   :  { %v214_v45 = vadd.f32 %v213_v38, %v183_v29  ;;  %v254_v29 = vmul.f32 %v155_v18, %v155_v18  ;;  %v314_v18 = vlaneseq }
  0x59   :  { %v279_v60 = vadd.f32 %v278_v15, %v248_v8 }
  0x5a   :  { %v215_v52 = vadd.f32 %v214_v45, %v184_v36 }
  0x5b   :  { %v280_v23 = vadd.f32 %v279_v60, %v249_v14 }
  0x5c   :  { %v216_v59 = vadd.f32 %v215_v52, %v185_v44  ;;  %v317_v52 = vand.u32 127, %v314_v18 }
  0x5d   :  { %v281_v25 = vadd.f32 %v280_v23, %v250_v17 }
  0x5e   :  { %v217_v2 = vadd.f32 %v216_v59, %v186_v51  ;;  %v315_v51 = vshrl.u32 %v314_v18, 7  ;;  %vm319_vm1 = vcmp.eq.s32.totalorder %v317_v52, 0  ;;  %vm323_vm2 = vcmp.eq.s32.totalorder %v317_v52, 1 }
  0x5f   :  { %v282_v26 = vadd.f32 %v281_v25, %v251_v21 }
  0x60   :  { %v218_v48 = vadd.f32 %v217_v2, %v187_v58  ;;  %vm318_vm0 = vcmp.eq.s32.totalorder %v315_v51, 0 }
  0x61   :  { %v283_v5 = vadd.f32 %v282_v26, %v252_v24  ;;  %vm320_vm3 = vmand %vm318_vm0, %vm319_vm1 }
  0x62   :  { %v219_v10 = vadd.f32 %v218_v48, %v188_v1  ;;  %vm324_vm4 = vmand %vm318_vm0, %vm323_vm2 }
  0x63   :  { %v284_v31 = vadd.f32 %v283_v5, %v253_v3 }
  0x64   :  { %v220_v16 = vadd.f32 %v219_v10, %v189_v7 }
  0x65   :  { %v285_v12 = vadd.f32 %v284_v31, %v254_v29 }
  0x66   :  { %v221_v19 = vadd.f32 %v220_v16, %v190_v54 }
  0x67   :  { %v286_v11 = vadd.f32 %v285_v12, %v255_v30 }
  0x68   :  { %v222_v62 = vadd.f32 %v221_v19, %v191_v55 }
  0x69   :  { %v287_v36 = vadd.f32 %v286_v11, %v256_v33 }
  0x6a   :  { %295 = vadd.xlane.f32.xlu0 %v222_v62 }
  0x6b   :  { %v288_v20 = vadd.f32 %v287_v36, %v257_v34 }
  0x6e   :  { %305 = vadd.xlane.f32.xlu0 %v288_v20 }
  0xf7   :  { %v296_v38 = vpop.xlane.xlu0 %295 }
  0xf8   :  { %v297_v28 = vrot.slane %v296_v38, 4 }
  0xfa   :  { %v298_v39 = vadd.f32 %v297_v28, %v296_v38 }
  0xfb   :  { %v306_v13 = vpop.xlane.xlu0 %305 }
  0xfc   :  { %v299_v40 = vrot.slane %v298_v39, 2  ;;  %v307_v44 = vrot.slane %v306_v13, 4 }
  0xfe   :  { %v300_v35 = vadd.f32 %v299_v40, %v298_v39  ;;  %v308_v45 = vadd.f32 %v307_v44, %v306_v13 }
 0x100   :  { %v301_v41 = vrot.slane %v300_v35, 1  ;;  %v309_v32 = vrot.slane %v308_v45, 2 }
 0x102   :  { %v302_v43 = vadd.f32 %v301_v41, %v300_v35  ;;  %v310_v46 = vadd.f32 %v309_v32, %v308_v45 }
 0x104   :  { %344 = vpush %v302_v43  ;;  %v311_v49 = vrot.slane %v310_v46, 1 }
 0x106   :  { %v312_v50 = vadd.f32 %v311_v49, %v310_v46 }
 0x108   :  { %346 = vpush %v312_v50 }
 0x135   :  { %s345_s1 = spop %344 }
 0x136   :  { %v321_v37 = vstv %s345_s1 }
 0x137   :  { %v322_v53 = vsel %vm320_vm3, %v321_v37, 0.0 }
 0x139   :  { %s347_s8 = spop %346 }
 0x13a   :  { %v325_v56 = vstv %s347_s8 }
 0x13b   :  { %v326_v57 = vsel %vm324_vm4, %v325_v56, %v322_v53 }
 0x13c   :  { %327 = vst [vmem:[#allocation9] sm:$0xff] %v326_v57 }
 0x13d   :  { %408 = shalt.err (!%p405_p6)
}
 0x13e   :  { %s409_s12 = scalar_lea.hbm %s553_s2, 128 }
 0x13f   :  { %p410_p7 = scmp.ne.s32.totalorder %s553_s2, %s409_s12  ;;  %p413_p8 = scmp.lt.u32.totalorder %s409_s12, %s553_s2 }
 0x141   :  { %p415_p9 = pnand %p413_p8, %p410_p7 }
 0x143   :  { %418 = shalt.err (!%p415_p9)
}
 0x144   :  { %337 = dma.vmem_to_hbm [thread:$0]  %s335_s7, 128, %s553_s2, [#allocation6]  }
 0x145   :  { %423 = dma.done.wait [#allocation6], 128  }
 0x146   :  { %424 = vsyncadd [#allocation6], 4294967168 }
 0x147   :  { %341 = vsyncpa [#allocation5], 1 }
 0x148   :  { %342 = vsyncpa [#allocation8], 1 }
 0x149   :  { %343 = vsyncpa [#allocation6], 1 }

</bundles_post_ra>
